<compile_context>
chip_gen: v7x
topology: tpu7x:2x2x1
jax: 0.10.0
libtpu: 0.0.40
codegen_flags: <defaults>
</compile_context>

<pallas_src>
import functools

import jax
import jax.numpy as jnp
import numpy as np
from jax import lax
from jax.experimental import pallas as pl
from jax.experimental.pallas import tpu as pltpu


MASK_VALUE = -0.7 * float(np.finfo(np.float32).max)   # finite "-inf" for causal mask
VMEM_LIMIT = 32 * 1024 * 1024                          # safe on v5e/v6e/v7x


def _fit(dim, target, align):
    """Largest tile <= target that divides `dim` and is a multiple of `align`.

    The full dimension is always a legal block (Pallas (8,128) rule), so dims that
    already fit under `target` are returned unchanged.  Only if no aligned divisor
    exists do we fall back to the full dim.
    """
    if dim <= target:
        return dim
    t = (target // align) * align
    while t >= align:
        if dim % t == 0:
            return t
        t -= align
    # TODO(synk): pad + mask instead of an un-tiled dimension for pathological shapes.
    return dim


def _rotate_half_roll(x, d_half):
    """roll(x, D/2, axis=-1): rotate_half with the sign folded into the sin table.

    Uses pltpu.roll (XLU slot, effectively free) when the lane dim is 128-aligned;
    falls back to a lane concat for tiny demo head dims.
    """
    if x.shape[-1] % 128 == 0:
        return pltpu.roll(x, shift=d_half, axis=-1)
    return jnp.concatenate([x[..., d_half:], x[..., :d_half]], axis=-1)


# ----------------------------- tiled matmul kernel --------------------------

def _matmul_kernel(x_ref, w_ref, o_ref, acc_ref):
    @pl.when(pl.program_id(2) == 0)
    def _():
        acc_ref[...] = jnp.zeros_like(acc_ref)

    acc_ref[...] += jnp.dot(x_ref[...], w_ref[...],
                            preferred_element_type=jnp.float32)

    @pl.when(pl.program_id(2) == pl.num_programs(2) - 1)
    def _():
        o_ref[...] = acc_ref[...].astype(o_ref.dtype)


def pallas_matmul(x, w, out_dtype=jnp.float32, tm=512, tn=512, tk=512):
    """x: (M, K) @ w: (K, N) -> (M, N); bf16 into the MXU, f32 VMEM accumulation.

    Tile defaults target the v5e roofline (~512^2).  On v6e grow tm/tn to 1024 (and
    raise vmem_limit accordingly); on v7x (64 MiB VMEM, 2 TCs) stay <=768 and keep at
    least 2 blocks along a parallel grid axis so both TensorCores get work.
    """
    M, K = x.shape
    K2, N = w.shape
    assert K == K2
    tm = _fit(M, tm, 8)
    tn = _fit(N, tn, 128)
    tk = _fit(K, tk, 128)
    grid = (M // tm, N // tn, K // tk)
    bytes_accessed = int((M * K + K * N) * x.dtype.itemsize
                         + M * N * jnp.dtype(out_dtype).itemsize)
    return pl.pallas_call(
        _matmul_kernel,
        out_shape=jax.ShapeDtypeStruct((M, N), out_dtype),
        grid_spec=pltpu.PrefetchScalarGridSpec(
            num_scalar_prefetch=0,
            grid=grid,
            in_specs=[pl.BlockSpec((tm, tk), lambda i, j, k: (i, k)),
                      pl.BlockSpec((tk, tn), lambda i, j, k: (k, j))],
            out_specs=pl.BlockSpec((tm, tn), lambda i, j, k: (i, j)),
            scratch_shapes=[pltpu.VMEM((tm, tn), jnp.float32)]),
        compiler_params=pltpu.CompilerParams(
            dimension_semantics=("parallel", "parallel", "arbitrary"),
            vmem_limit_bytes=VMEM_LIMIT),
        cost_estimate=pl.CostEstimate(flops=int(2 * M * N * K),
                                      transcendentals=0,
                                      bytes_accessed=bytes_accessed),
    )(x, w)


# ------------------- flash attention kernel (RoPE-fused Q) ------------------

def _flash_attn_kernel(q_ref, k_ref, v_ref, cq_ref, sq_ref,
                       o_ref, qr_ref, m_ref, l_ref, acc_ref,
                       *, tq, tkv, group, d_half):
    # q_ref block:  (1, group, tq, D)  bf16, pre-RoPE (all heads of one KV group)
    # k_ref/v_ref:  (1, 1, tkv, D)     bf16 (K already roped -- KV-cache layout)
    # cq/sq blocks: (1, tq, D)         f32, Q cos / sign-folded sin, 1/sqrt(D) folded in
    qi = pl.program_id(2)
    ki = pl.program_id(3)
    nk = pl.num_programs(3)
    gq = group * tq

    @pl.when(ki == 0)
    def _():
        # m is initialized to MASK_VALUE (not -inf); safe because the ki=0 block always
        # contains unmasked columns (k_start = 0) for every query row.
        m_ref[...] = jnp.full_like(m_ref, MASK_VALUE)
        l_ref[...] = jnp.zeros_like(l_ref)
        acc_ref[...] = jnp.zeros_like(acc_ref)
        # Fused RoPE for Q, once per q tile (amortized over all KV steps).  The scale
        # is pre-folded into cos/sin, so no per-block score scaling is needed later.
        cos = cq_ref[0]                                   # (tq, D) f32
        sin = sq_ref[0]                                   # (tq, D) f32, sign-folded
        for g in range(group):                            # static, tiny
            qg = q_ref[0, g].astype(jnp.float32)          # (tq, D)
            roped = qg * cos + _rotate_half_roll(qg, d_half) * sin
            qr_ref[pl.ds(g * tq, tq), :] = roped.astype(qr_ref.dtype)

    q_start = qi * tq
    k_start = ki * tkv
    q_last = q_start + tq - 1
    k_last = k_start + tkv - 1

    def do_block(masked):
        k = k_ref[0, 0]                                   # (tkv, D) bf16, roped
        v = v_ref[0, 0]                                   # (tkv, D) bf16
        qr = qr_ref[...]                                  # (group*tq, D) bf16
        # One batched MXU matmul for the whole GQA group (contract last dims; no k.T).
        s = lax.dot_general(qr, k, (((1,), (1,)), ((), ())),
                            preferred_element_type=jnp.float32)    # (gq, tkv)
        if masked:
            rows = q_start + (lax.broadcasted_iota(jnp.int32, (gq, tkv), 0) % tq)
            cols = k_start + lax.broadcasted_iota(jnp.int32, (gq, tkv), 1)
            s = jnp.where(cols <= rows, s, MASK_VALUE)
        m_prev = m_ref[...]                                         # (gq, 1)
        m_new = jnp.maximum(m_prev, jnp.max(s, axis=-1, keepdims=True))
        alpha = jnp.exp(m_prev - m_new)
        p = jnp.exp(s - m_new)                                      # f32
        l_ref[...] = alpha * l_ref[...] + jnp.sum(p, axis=-1, keepdims=True)
        acc_ref[...] = alpha * acc_ref[...] + lax.dot_general(
            p.astype(v.dtype), v, (((1,), (0,)), ((), ())),
            preferred_element_type=jnp.float32)
        m_ref[...] = m_new

    # Fully below the diagonal: no mask needed.
    @pl.when(k_last <= q_start)
    def _():
        do_block(False)

    # Diagonal-overlap block: build the iota mask.  Fully-above-diagonal blocks are
    # skipped (and their K/V DMA is elided by the clamped index_map in the wrapper).
    @pl.when(jnp.logical_and(k_start <= q_last, k_last > q_start))
    def _():
        do_block(True)

    @pl.when(ki == nk - 1)
    def _():
        out = acc_ref[...] * pl.reciprocal(l_ref[...], approx=True)   # (gq, D) f32
        for g in range(group):
            o_ref[0, g] = out[g * tq:(g + 1) * tq, :].astype(o_ref.dtype)


def pallas_flash_attention(q, k, v, cos_q, sin_q, tq=256, tkv=512):
    """Causal GQA flash attention with RoPE fused on the Q side.

    q: (B, nH, S, D) bf16 (pre-RoPE); k, v: (B, nKV, S, D) bf16 (k already roped);
    cos_q/sin_q: (B, S, D) f32 Q tables (sign-folded sin, 1/sqrt(D) folded in).
    Returns (B, nH, S, D) in q.dtype.
    """
    B, nH, S, D = q.shape
    nKV = k.shape[1]
    group = nH // nKV
    # v6e: raising tq to 512 halves K/V re-streaming; v7x/v5e keep 256/512 (VMEM).
    tq = _fit(S, tq, 8)
    tkv = _fit(S, tkv, 8)
    nq, nk = S // tq, S // tkv

    def kv_block(qi, ki):
        # Clamp to the last causally-needed KV block for this q tile: on fully-masked
        # (compute-skipped) steps the block index repeats and Pallas elides the DMA.
        return jnp.minimum(ki, (qi * tq + tq - 1) // tkv)

    kernel = functools.partial(_flash_attn_kernel, tq=tq, tkv=tkv,
                               group=group, d_half=D // 2)
    flops = 2 * B * nH * S * S * D                      # QK^T + P.V, causal ~ half
    transcendentals = B * nH * S * S // 2
    kv_restream = max(1, (nq + 1) // 2)
    bytes_accessed = int(2 * B * nH * S * D * 2
                         + 2 * B * nKV * S * D * 2 * kv_restream
                         + 2 * B * S * D * 4)
    return pl.pallas_call(
        kernel,
        out_shape=jax.ShapeDtypeStruct((B, nH, S, D), q.dtype),
        grid_spec=pltpu.PrefetchScalarGridSpec(
            num_scalar_prefetch=0,
            grid=(B, nKV, nq, nk),
            in_specs=[
                pl.BlockSpec((1, group, tq, D), lambda b, h, qi, ki: (b, h, qi, 0)),
                pl.BlockSpec((1, 1, tkv, D),
                             lambda b, h, qi, ki: (b, h, kv_block(qi, ki), 0)),
                pl.BlockSpec((1, 1, tkv, D),
                             lambda b, h, qi, ki: (b, h, kv_block(qi, ki), 0)),
                pl.BlockSpec((1, tq, D), lambda b, h, qi, ki: (b, qi, 0)),
                pl.BlockSpec((1, tq, D), lambda b, h, qi, ki: (b, qi, 0)),
            ],
            out_specs=pl.BlockSpec((1, group, tq, D),
                                   lambda b, h, qi, ki: (b, h, qi, 0)),
            scratch_shapes=[
                pltpu.VMEM((group * tq, D), jnp.bfloat16),   # roped + scaled Q
                pltpu.VMEM((group * tq, 1), jnp.float32),    # running max m
                pltpu.VMEM((group * tq, 1), jnp.float32),    # running sum l
                pltpu.VMEM((group * tq, D), jnp.float32),    # output accumulator
            ]),
        compiler_params=pltpu.CompilerParams(
            dimension_semantics=("parallel", "parallel", "parallel", "arbitrary"),
            vmem_limit_bytes=VMEM_LIMIT),
        cost_estimate=pl.CostEstimate(flops=int(flops),
                                      transcendentals=int(transcendentals),
                                      bytes_accessed=bytes_accessed),
    )(q, k, v, cos_q, sin_q)


# ------------ output projection consuming head-major attention --------------

def _outproj_kernel(a_ref, w_ref, o_ref, acc_ref):
    h = pl.program_id(3)

    @pl.when(h == 0)
    def _():
        acc_ref[...] = jnp.zeros_like(acc_ref)

    acc_ref[...] += jnp.dot(a_ref[0, 0], w_ref[0],
                            preferred_element_type=jnp.float32)

    @pl.when(h == pl.num_programs(3) - 1)
    def _():
        o_ref[0] = acc_ref[...].astype(o_ref.dtype)


def pallas_attn_out_proj(attn, wo3, out_dtype=jnp.float32, tm=256, tn=512):
    """attn: (B, nH, S, D) bf16 consumed in place; wo3: (nH, D, H) -> (B, S, H).

    The per-head contraction is a grid reduction, so no transpose/reshape of the
    attention output ever touches HBM.
    """
    B, nH, S, D = attn.shape
    H = wo3.shape[-1]
    tm = _fit(S, tm, 8)
    tn = _fit(H, tn, 128)
    grid = (B, S // tm, H // tn, nH)
    bytes_accessed = int(B * nH * S * D * 2 + nH * D * H * 2
                         + B * S * H * jnp.dtype(out_dtype).itemsize)
    return pl.pallas_call(
        _outproj_kernel,
        out_shape=jax.ShapeDtypeStruct((B, S, H), out_dtype),
        grid_spec=pltpu.PrefetchScalarGridSpec(
            num_scalar_prefetch=0,
            grid=grid,
            in_specs=[pl.BlockSpec((1, 1, tm, D), lambda b, i, j, h: (b, h, i, 0)),
                      pl.BlockSpec((1, D, tn), lambda b, i, j, h: (h, 0, j))],
            out_specs=pl.BlockSpec((1, tm, tn), lambda b, i, j, h: (b, i, j)),
            scratch_shapes=[pltpu.VMEM((tm, tn), jnp.float32)]),
        compiler_params=pltpu.CompilerParams(
            dimension_semantics=("parallel", "parallel", "parallel", "arbitrary"),
            vmem_limit_bytes=VMEM_LIMIT),
        cost_estimate=pl.CostEstimate(flops=int(2 * B * S * nH * D * H),
                                      transcendentals=0,
                                      bytes_accessed=bytes_accessed),
    )(attn, wo3)


# ------------------------------ JAX glue ------------------------------------

def rotary_cache(head_dim, max_pos, base=10000.0):
    """LlamaRotaryEmbedding._set_cos_sin_cache."""
    inv_freq = 1.0 / (base ** (jnp.arange(0, head_dim, 2, dtype=jnp.float32) / head_dim))
    t = jnp.arange(max_pos, dtype=jnp.float32)
    freqs = jnp.einsum("i,j->ij", t, inv_freq)          # (max_pos, head_dim/2)
    emb = jnp.concatenate([freqs, freqs], axis=-1)      # (max_pos, head_dim)
    cos = jnp.cos(emb)[None, None, :, :]                # (1, 1, max_pos, head_dim)
    sin = jnp.sin(emb)[None, None, :, :]
    return cos, sin


def llama_rotary_embedding(cos_cached, sin_cached, seq_len, dtype=jnp.float32):
    """LlamaRotaryEmbedding.forward: slice cached tables to seq_len."""
    return (cos_cached[:, :, :seq_len, :].astype(dtype),
            sin_cached[:, :, :seq_len, :].astype(dtype))


def rotate_half(x):
    d = x.shape[-1] // 2
    return jnp.concatenate([-x[..., d:], x[..., :d]], axis=-1)


def apply_rotary_pos_emb(q, k, cos, sin, position_ids):
    # Reference path only. q, k: (B, S, nH, D); cos/sin: (1, 1, P, D).
    cos = cos[0, 0][position_ids][:, :, None, :]        # (B, S, 1, D)
    sin = sin[0, 0][position_ids][:, :, None, :]
    q_embed = q * cos + rotate_half(q) * sin
    k_embed = k * cos + rotate_half(k) * sin
    return q_embed, k_embed


def llama_attention_prefill(hidden_states, kernel_params, cos_cached, sin_cached,
                            position_ids, num_heads, num_kv_heads):
    B, S, H = hidden_states.shape
    head_dim = H // num_heads
    half = head_dim // 2
    scale = 1.0 / (head_dim ** 0.5)
    qdim = num_heads * head_dim
    kvdim = num_kv_heads * head_dim

    w_qkv = kernel_params["w_qkv"]   # (H, qdim + 2*kvdim) bf16, pre-fused [Wq.T|Wk.T|Wv.T]
    wo3 = kernel_params["wo3"]       # (nH, D, H)           bf16, Wo.T head-major

    # Fused Q/K/V projection: x read from HBM once, bf16 into the MXU, f32 accum.
    x2 = hidden_states.reshape(B * S, H).astype(jnp.bfloat16)
    qkv = pallas_matmul(x2, w_qkv, out_dtype=jnp.bfloat16)

    q = qkv[:, :qdim].reshape(B, S, num_heads, head_dim)
    k = qkv[:, qdim:qdim + kvdim].reshape(B, S, num_kv_heads, head_dim)
    v = qkv[:, qdim + kvdim:].reshape(B, S, num_kv_heads, head_dim)

    # LlamaRotaryEmbedding.forward: slice the cached cos/sin tables to seq_len.
    cos_s, sin_s = llama_rotary_embedding(cos_cached, sin_cached, S)
    cos_t, sin_t = cos_s[0, 0], sin_s[0, 0]             # (S, D) f32
    # Sign-fold sin so rotate_half(x) becomes a plain roll by D/2 inside the kernel.
    sign = jnp.concatenate([jnp.full((half,), -1.0, jnp.float32),
                            jnp.ones((half,), jnp.float32)])
    sinf_t = sin_t * sign
    cos_g = cos_t[position_ids]                          # (B, S, D) gathered positions
    sinf_g = sinf_t[position_ids]

    # K RoPE stays in XLA: the roped K must land in HBM anyway (KV cache), and it is
    # consumed directly by the attention kernel (no duplicate rope inside the kernel).
    kf = k.astype(jnp.float32)
    k_rope = (kf * cos_g[:, :, None, :] +
              jnp.roll(kf, half, axis=-1) * sinf_g[:, :, None, :]).astype(jnp.bfloat16)

    # Q-side tables for the in-kernel RoPE: the 1/sqrt(D) score scale is folded in.
    cos_q = cos_g * scale
    sin_q = sinf_g * scale

    # TODO(synk): remove these transposes by writing Q/K/V head-major straight from the
    # QKV matmul out_specs (tn = head_dim) once head_dim % 128 == 0.
    qt = q.transpose(0, 2, 1, 3)        # (B, nH,  S, D) bf16 (pre-RoPE; roped in-kernel)
    kt = k_rope.transpose(0, 2, 1, 3)   # (B, nKV, S, D) bf16 (roped)
    vt = v.transpose(0, 2, 1, 3)        # (B, nKV, S, D) bf16

    attn = pallas_flash_attention(qt, kt, vt, cos_q, sin_q)   # (B, nH, S, D) bf16

    # Output projection consumes head-major attention in place -- no transpose/reshape.
    out = pallas_attn_out_proj(attn, wo3, out_dtype=jnp.float32)   # (B, S, H) f32
    return out, (k_rope, v)


# ------------------------- reference (pure JAX, f32) -------------------------

def reference_prefill(hidden_states, params, cos, sin, position_ids,
                      num_heads, num_kv_heads):
    B, S, H = hidden_states.shape
    head_dim = H // num_heads
    scale = 1.0 / (head_dim ** 0.5)
    wq, wk, wv, wo = params["wq"], params["wk"], params["wv"], params["wo"]

    q = (hidden_states @ wq.T).reshape(B, S, num_heads, head_dim)
    k = (hidden_states @ wk.T).reshape(B, S, num_kv_heads, head_dim)
    v = (hidden_states @ wv.T).reshape(B, S, num_kv_heads, head_dim)
    cos_s, sin_s = llama_rotary_embedding(cos, sin, S)
    q, k = apply_rotary_pos_emb(q, k, cos_s, sin_s, position_ids)

    group = num_heads // num_kv_heads
    kf = jnp.repeat(k, group, axis=2)
    vf = jnp.repeat(v, group, axis=2)
    qt, kt, vt = (t.transpose(0, 2, 1, 3) for t in (q, kf, vf))

    s = jnp.einsum("bhqd,bhkd->bhqk", qt, kt) * scale
    mask = jnp.tril(jnp.ones((S, S), dtype=bool))
    s = jnp.where(mask[None, None], s, -jnp.inf)
    p = jax.nn.softmax(s, axis=-1)
    o = jnp.einsum("bhqk,bhkd->bhqd", p, vt)
    o = o.transpose(0, 2, 1, 3).reshape(B, S, H)
    return o @ wo.T


# ---------------------------------- main -------------------------------------

if __name__ == "__main__":
    hidden_size = 32
    num_heads = 4
    num_kv_heads = 2
    head_dim = hidden_size // num_heads
    max_position_embeddings = 64
    B, S = 2, 8

    key = jax.random.PRNGKey(0)
    k0, k1, k2, k3, k4 = jax.random.split(key, 5)

    params = {
        "wq": 0.1 * jax.random.normal(k1, (num_heads * head_dim, hidden_size), jnp.float32),
        "wk": 0.1 * jax.random.normal(k2, (num_kv_heads * head_dim, hidden_size), jnp.float32),
        "wv": 0.1 * jax.random.normal(k3, (num_kv_heads * head_dim, hidden_size), jnp.float32),
        "wo": 0.1 * jax.random.normal(k4, (hidden_size, num_heads * head_dim), jnp.float32),
    }

    hidden_states = jax.random.normal(k0, (B, S, hidden_size), jnp.float32)
    position_ids = jnp.broadcast_to(jnp.arange(S, dtype=jnp.int32), (B, S))
    cos_cached, sin_cached = rotary_cache(head_dim, max_position_embeddings)

    # Pre-cast / pre-transpose / fuse the weights ONCE outside the hot path.
    wq_b = params["wq"].astype(jnp.bfloat16)
    wk_b = params["wk"].astype(jnp.bfloat16)
    wv_b = params["wv"].astype(jnp.bfloat16)
    wo_b = params["wo"].astype(jnp.bfloat16)
    kernel_params = {
        "w_qkv": jnp.concatenate([wq_b.T, wk_b.T, wv_b.T], axis=1),      # (H, q+2kv)
        "wo3": wo_b.T.reshape(num_heads, head_dim, hidden_size),         # (nH, D, H)
    }

    out, (k_states, v_states) = llama_attention_prefill(
        hidden_states, kernel_params, cos_cached, sin_cached, position_ids,
        num_heads, num_kv_heads)
    out = jax.block_until_ready(out)

    # Reference computed in f32 from the same bf16-rounded inputs/weights.
    ref_params = {n: params[n].astype(jnp.bfloat16).astype(jnp.float32) for n in params}
    ref_hidden = hidden_states.astype(jnp.bfloat16).astype(jnp.float32)
    ref = reference_prefill(ref_hidden, ref_params, cos_cached, sin_cached,
                            position_ids, num_heads, num_kv_heads)
    np.testing.assert_allclose(np.asarray(out), np.asarray(ref), rtol=2e-2, atol=2e-2)

    print("KERNEL_OK")
</pallas_src>

<mosaic_0001>
module attributes {stable_mosaic.version = 11 : i64} {
  func.func @_matmul_kernel(%arg0: i32, %arg1: i32, %arg2: i32, %arg3: memref<16x32xbf16, #tpu.memory_space<vmem>>, %arg4: memref<32x64xbf16, #tpu.memory_space<vmem>>, %arg5: memref<16x64xbf16, #tpu.memory_space<vmem>>, %arg6: memref<16x64xf32, #tpu.memory_space<vmem>>) attributes {dimension_semantics = [#tpu.dimension_semantics<parallel>, #tpu.dimension_semantics<parallel>, #tpu.dimension_semantics<arbitrary>], iteration_bounds = array<i64: 1, 1, 1>, scalar_prefetch = 0 : i64, scratch_operands = 1 : i64, tpu.core_type = #tpu.core_type<tc>, window_params = [{transform_indices = @transform_0, window_bounds = array<i64: 16, 32>}, {transform_indices = @transform_1, window_bounds = array<i64: 32, 64>}, {transform_indices = @transform_2, window_bounds = array<i64: 16, 64>}]} {
    %c0_i32 = arith.constant 0 : i32
    %0 = arith.cmpi eq, %arg2, %c0_i32 : i32
    %1 = arith.extui %0 : i1 to i32
    %c0_i32_0 = arith.constant 0 : i32
    %2 = arith.cmpi ne, %1, %c0_i32_0 : i32
    scf.if %2 {
      %cst_10 = arith.constant 0.000000e+00 : f32
      %12 = vector.broadcast %cst_10 : f32 to vector<16x64xf32>
      %c0_11 = arith.constant 0 : index
      %c0_12 = arith.constant 0 : index
      %13 = vector.load %arg6[%c0_11, %c0_12] : memref<16x64xf32, #tpu.memory_space<vmem>>, vector<16x64xf32>
      tpu.vector_store %arg6[%c0_11, %c0_12], %12 {strides = array<i32>} : memref<16x64xf32, #tpu.memory_space<vmem>>, vector<16x64xf32>,
    } else {
    }
    %c0 = arith.constant 0 : index
    %c0_1 = arith.constant 0 : index
    %3 = vector.load %arg6[%c0, %c0_1] : memref<16x64xf32, #tpu.memory_space<vmem>>, vector<16x64xf32>
    %c0_2 = arith.constant 0 : index
    %c0_3 = arith.constant 0 : index
    %4 = vector.load %arg3[%c0_2, %c0_3] : memref<16x32xbf16, #tpu.memory_space<vmem>>, vector<16x32xbf16>
    %c0_4 = arith.constant 0 : index
    %c0_5 = arith.constant 0 : index
    %5 = vector.load %arg4[%c0_4, %c0_5] : memref<32x64xbf16, #tpu.memory_space<vmem>>, vector<32x64xbf16>
    %cst = arith.constant dense<0.000000e+00> : vector<16x64xf32>
    %6 = tpu.matmul %4, %5, %cst {dimension_numbers = #tpu.dot_dimension_numbers<[1], [0], [0], [1], [0, 0, 1, 1], [], []>} : vector<16x32xbf16>, vector<32x64xbf16>, vector<16x64xf32> -> vector<16x64xf32>
    %7 = arith.addf %3, %6 : vector<16x64xf32>
    %c0_6 = arith.constant 0 : index
    %c0_7 = arith.constant 0 : index
    %8 = vector.load %arg6[%c0_6, %c0_7] : memref<16x64xf32, #tpu.memory_space<vmem>>, vector<16x64xf32>
    tpu.vector_store %arg6[%c0_6, %c0_7], %7 {strides = array<i32>} : memref<16x64xf32, #tpu.memory_space<vmem>>, vector<16x64xf32>,
    %c0_i32_8 = arith.constant 0 : i32
    %9 = arith.cmpi eq, %arg2, %c0_i32_8 : i32
    %10 = arith.extui %9 : i1 to i32
    %c0_i32_9 = arith.constant 0 : i32
    %11 = arith.cmpi ne, %10, %c0_i32_9 : i32
    scf.if %11 {
      %c0_10 = arith.constant 0 : index
      %c0_11 = arith.constant 0 : index
      %12 = vector.load %arg6[%c0_10, %c0_11] : memref<16x64xf32, #tpu.memory_space<vmem>>, vector<16x64xf32>
      %13 = arith.truncf %12 : vector<16x64xf32> to vector<16x64xbf16>
      %c0_12 = arith.constant 0 : index
      %c0_13 = arith.constant 0 : index
      %14 = vector.load %arg5[%c0_12, %c0_13] : memref<16x64xbf16, #tpu.memory_space<vmem>>, vector<16x64xbf16>
      tpu.vector_store %arg5[%c0_12, %c0_13], %13 {strides = array<i32>} : memref<16x64xbf16, #tpu.memory_space<vmem>>, vector<16x64xbf16>,
    } else {
    }
    return
  }
  func.func @transform_0(%arg0: i32, %arg1: i32, %arg2: i32) -> (i32, i32) {
    %c0_i32 = arith.constant 0 : i32
    return %arg0, %arg2 : i32, i32
  }
  func.func @transform_1(%arg0: i32, %arg1: i32, %arg2: i32) -> (i32, i32) {
    %c0_i32 = arith.constant 0 : i32
    return %arg2, %arg1 : i32, i32
  }
  func.func @transform_2(%arg0: i32, %arg1: i32, %arg2: i32) -> (i32, i32) {
    %c0_i32 = arith.constant 0 : i32
    return %arg0, %arg1 : i32, i32
  }
}

</mosaic_0001>

<bundles_post_ra>
// kernel: tpu_custom_call.1
= control target key start
LH: loop header
LB: loop body
LE: loop exit
PB: predicated region body
PF: predicated region fallthrough
CT: control target
= control target key end

     0   :  { %7 = vsyncpa [#allocation4], 0  ;;  %s329_s0 = inlined_call_operand.hbm [shape: bf16[16,32], index: 0, kind: input, shape index: {}]   ;;  %s330_s1 = inlined_call_operand.hbm [shape: bf16[32,64], index: 1, kind: input, shape index: {}]   ;;  %s331_s2 = inlined_call_operand.hbm [shape: bf16[16,64], index: 2, kind: output, shape index: {}]  }
   0x1   :  { %8 = vsyncpa [#allocation7], 0 }
   0x2   :  { %9 = vsyncpa [#allocation5], 0  ;;  %s258_s9 = smov [#allocation3]   ;;  %s186_s13 = scalar_lea.hbm %s329_s0, 128 }
   0x3   :  { %s15_s10 = sshll.u32 %s258_s9, 4  ;;  %p187_p0 = scmp.ne.s32.totalorder %s329_s0, %s186_s13  ;;  %s16_s10 = int_to_ptr.vmem [resolvable:$true] %s15_s10 }
   0x4   :  { %p190_p1 = scmp.lt.u32.totalorder %s186_s13, %s329_s0 }
   0x6   :  { %p192_p2 = pnand %p190_p1, %p187_p0 }
   0x8   :  { %195 = shalt.err (!%p192_p2)
}
   0x9   :  { %s196_s18 = scalar_lea.vmem %s16_s10, 128  ;;  %p201_p4 = scmp.lt.s32.totalorder %s16_s10, %s16_s10 }
   0xa   :  { %p197_p3 = scmp.ne.s32.totalorder %s16_s10, %s196_s18  ;;  %p202_p5 = scmp.lt.s32.totalorder %s196_s18, %s196_s18 }
   0xc   :  { %p203_p6 = por %p202_p5, %p201_p4 }
   0xe   :  { %p204_p7 = pnand %p203_p6, %p197_p3 }
  0x10   :  { %207 = shalt.err (!%p204_p7)
}
  0x11   :  { %s259_s19 = smov 64   ;;  %s260_s20 = smov 4  }
  0x12   :  { %21 = dma.hbm_to_vmem [thread:$0]  %s329_s0, 128, %s16_s10, [#allocation4], %s259_s19, %s259_s19, %s260_s20  }
  0x13   :  { %s261_s23 = smov [#allocation6]   ;;  %s208_s27 = scalar_lea.hbm %s330_s1, 256 }
  0x14   :  { %s27_s24 = sshll.u32 %s261_s23, 4  ;;  %p209_p8 = scmp.ne.s32.totalorder %s330_s1, %s208_s27  ;;  %s28_s24 = int_to_ptr.vmem [resolvable:$true] %s27_s24 }
  0x15   :  { %p212_p9 = scmp.lt.u32.totalorder %s208_s27, %s330_s1 }
  0x17   :  { %p214_p10 = pnand %p212_p9, %p209_p8 }
  0x19   :  { %217 = shalt.err (!%p214_p10)
}
  0x1a   :  { %s218_s4 = scalar_lea.vmem %s28_s24, 256  ;;  %p223_p12 = scmp.lt.s32.totalorder %s28_s24, %s28_s24 }
  0x1b   :  { %p219_p11 = scmp.ne.s32.totalorder %s28_s24, %s218_s4  ;;  %p224_p13 = scmp.lt.s32.totalorder %s218_s4, %s218_s4 }
  0x1d   :  { %p225_p0 = por %p224_p13, %p223_p12 }
  0x1f   :  { %p226_p1 = pnand %p225_p0, %p219_p11 }
  0x21   :  { %229 = shalt.err (!%p226_p1)
}
  0x22   :  { %33 = dma.hbm_to_vmem [thread:$0]  %s330_s1, 256, %s28_s24, [#allocation7], %s259_s19, %s259_s19, %s260_s20  }
  0x23   :  { %252 = dma.done.wait [#allocation4], 128  }
  0x24   :  { %253 = vsyncadd [#allocation4], 4294967168 }
  0x25   :  { %254 = dma.done.wait [#allocation7], 256  }
  0x26   :  { %255 = vsyncadd [#allocation7], 4294967040  ;;  %vm45_vm0 = vcmask 523264   ;;  %v262_v0 = vmov 0.0   ;;  %vm263_vm1 = vmmov 0   ;;  %v183_v1 = vld [vmem:[#allocation6] sm:$0xff]  }
  0x27   :  { %46 = vst.msk [vmem:[#allocation2] sm:$0xff] %vm45_vm0, %v262_v0  ;;  %47 = vst.msk [vmem:[#allocation2 + $0x8] sm:$0xff] %vm45_vm0, %v262_v0  ;;  %168 = vmatprep.subr.bf16.mxu0 %v262_v0  ;;  %172 = vmatprep.mubr.msk.bf16.mxu0 %vm263_vm1, %v262_v0  ;;  %v184_v2 = vld [vmem:[#allocation6 + $0x8] sm:$0xff]   ;;  %v185_v3 = vld [vmem:[#allocation3] sm:$0xff]   ;;  %vm73_vm2 = vcmask 261120   ;;  %vm136_vm3 = vcmask 519168  }
  0x28   :  { %169 = vmatpush3.bf16.msra.mxu0 %v183_v1  ;;  %s264_s1 = smov [#allocation8]  }
  0x29   :  { %170 = vmatprep.subr.bf16.mxu0 %v262_v0  ;;  %s144_s6 = sshll.u32 %s264_s1, 4  ;;  %s145_s6 = int_to_ptr.vmem [resolvable:$true] %s144_s6 }
  0x2a   :  { %s230_s7 = scalar_lea.vmem %s145_s6, 128  ;;  %p235_p3 = scmp.lt.s32.totalorder %s145_s6, %s145_s6 }
  0x2b   :  { %p231_p2 = scmp.ne.s32.totalorder %s145_s6, %s230_s7  ;;  %p236_p4 = scmp.lt.s32.totalorder %s230_s7, %s230_s7 }
  0x2c   :  { %171 = vmatpush3.bf16.msra.mxu0 %v184_v2 }
  0x2d   :  { %p237_p5 = por %p236_p4, %p235_p3 }
  0x2e   :  { %v48_v4 = vld [vmem:[#allocation2] sm:$0xff]  ;;  %v49_v6 = vld [vmem:[#allocation2 + $0x8] sm:$0xff] }
  0x2f   :  { %173 = vmatmul.mubr.msk.bf16.vlgmr.msra.gmra.mrb[0].mxu0 %vm73_vm2, %v185_v3  ;;  %p238_p6 = pnand %p237_p5, %p231_p2 }
 0x102   :  { %v111_v5 = vpop.f32.mrb[0].mxu0 }
 0x103   :  { %v118_v7 = vadd.f32 %v111_v5, %v48_v4  ;;  %v174_v8 = vpop.f32.mrb[1].mxu0 }
 0x104   :  { %v114_v9 = vpop.f32.mrb[2].mxu0 }
 0x105   :  { %121 = vst.msk [vmem:[#allocation2] sm:$0xff] %vm45_vm0, %v118_v7  ;;  %v119_v10 = vadd.f32 %v114_v9, %v49_v6  ;;  %v175_v11 = vpop.f32.mrb[3].mxu0 }
 0x107   :  { %122 = vst.msk [vmem:[#allocation2 + $0x8] sm:$0xff] %vm45_vm0, %v119_v10 }
 0x10c   :  { %v126_v12 = vld [vmem:[#allocation2] sm:$0xff] }
 0x10d   :  { %v163_v13 = vpack.c.bf16 %v126_v12, %v126_v12 }
 0x10e   :  { %v127_v14 = vld [vmem:[#allocation2 + $0x8] sm:$0xff] }
 0x10f   :  { %v164_v15 = vpack.c.bf16 %v127_v14, %v127_v14  ;;  %137 = vst.msk [vmem:[#allocation8] sm:$0xf] %vm136_vm3, %v163_v13 }
 0x111   :  { %138 = vst.msk [vmem:[#allocation8 + $0x4] sm:$0xf] %vm136_vm3, %v164_v15 }
 0x112   :  { %241 = shalt.err (!%p238_p6)
}
 0x113   :  { %s242_s10 = scalar_lea.hbm %s331_s2, 128 }
 0x114   :  { %p243_p7 = scmp.ne.s32.totalorder %s331_s2, %s242_s10  ;;  %p246_p8 = scmp.lt.u32.totalorder %s242_s10, %s331_s2 }
 0x116   :  { %p248_p9 = pnand %p246_p8, %p243_p7 }
 0x118   :  { %251 = shalt.err (!%p248_p9)
}
 0x119   :  { %150 = dma.vmem_to_hbm [thread:$0]  %s145_s6, 128, %s331_s2, [#allocation5], %s259_s19, %s259_s19, %s260_s20  }
 0x11a   :  { %256 = dma.done.wait [#allocation5], 128  }
 0x11b   :  { %257 = vsyncadd [#allocation5], 4294967168 }
 0x11c   :  { %154 = vsyncpa [#allocation4], 1 }
 0x11d   :  { %155 = vsyncpa [#allocation7], 1 }
 0x11e   :  { %156 = vsyncpa [#allocation5], 1 }

</bundles_post_ra>
